<compile_context>
chip_gen: v7x
topology: tpu7x:2x2x1
jax: 0.10.0
libtpu: 0.0.40
codegen_flags: <defaults>
</compile_context>

<pallas_src>
import functools
import math

import jax
import jax.numpy as jnp
from jax.experimental import pallas as pl
from jax.experimental.pallas import tpu as pltpu


def _round_up(x, m):
    return (x + m - 1) // m * m


def _vmem_capacity_bytes():
    # On v7x this should be the per-TensorCore capacity (64 MiB); the 1/4 budget
    # below keeps us safely inside either a per-core or per-chip reading.
    try:
        return int(pltpu.get_tpu_info().vmem_capacity_bytes)
    except Exception:
        return 64 * 1024 * 1024  # assume the tightest generation (v7x per-core)


def _per_step_vmem_bytes(tl, c_in, c_out, kc_pad, halo, in_isz, out_isz):
    return (2 * c_in * (tl + halo) * in_isz   # input halo tile, double-buffered
            + 2 * c_out * tl * out_isz        # output tile, double-buffered
            + kc_pad * tl * in_isz            # stacked matmul RHS
            + c_out * tl * 4                  # f32 matmul result
            + c_out * kc_pad * in_isz         # fused weights (resident)
            + c_out * 4)                      # fused bias (f32, resident)


def _pick_tile_l(l_out, c_in, c_out, kc_pad, halo, in_isz, out_isz, vmem_cap):
    """Largest 128-multiple L tile whose working set fits a conservative budget."""
    budget = vmem_cap // 4   # headroom for compiler scratch / pipelining slack
    tl = 1024                # measured sweet spot is 512-1024 lanes
    while tl > 128 and _per_step_vmem_bytes(
            tl, c_in, c_out, kc_pad, halo, in_isz, out_isz) > budget:
        tl //= 2
    return min(tl, max(128, _round_up(l_out, 128)))


def _dwsep_fused_kernel(x_ref, w2_ref, b_ref, o_ref, *,
                        kernel_size, dilation, tile_l, c_in, kc_pad):
    """One grid step = one (batch row, length tile) output block.

    x_ref : (C_in, TL + halo)   halo'd input tile, compute dtype (f32 or bf16)
    w2_ref: (C_out, KC_pad)     fused depthwise*pointwise weights, compute dtype
    b_ref : (C_out, 1)          fused bias (depthwise bias folded in), f32
    o_ref : (C_out, TL)         output tile (lane-dense)
    """
    # Stack the K dilated tap windows into the matmul RHS (KC_pad, TL).
    windows = [x_ref[:, pl.ds(k * dilation, tile_l)] for k in range(kernel_size)]
    kc = kernel_size * c_in
    if kc_pad > kc:
        # Zero rows matching the zero-padded weight columns (alignment only).
        windows.append(jnp.zeros((kc_pad - kc, tile_l), x_ref.dtype))
    rhs = jnp.concatenate(windows, axis=0)

    # Single fused matmul: contraction depth K*C_in, f32 accumulation on the MXU.
    y = jnp.dot(w2_ref[...], rhs, preferred_element_type=jnp.float32)
    y = y + b_ref[...]
    o_ref[...] = y.astype(o_ref.dtype)


def depthwise_separable_conv1d(x, dw_w, dw_b, pw_w, pw_b, *, kernel_size,
                               dilation=1, padding=0,
                               compute_dtype=jnp.float32, out_dtype=None,
                               tile_l=None):
    """x: (N, C_in, L).  dw_w: (C_in, 1, K), dw_b: (C_in,),
    pw_w: (C_out, C_in, 1), pw_b: (C_out,).  Returns (N, C_out, L_out).

    compute_dtype=bf16 ships the input tiles and fused weights as bf16 over HBM
    (f32 accumulation in the MXU); out_dtype controls the store-side dtype.
    """
    N, C_in, L = x.shape
    C_out = pw_w.shape[0]
    K = kernel_size
    halo = dilation * (K - 1)
    L_out = L + 2 * padding - halo
    assert L_out > 0, "output length must be positive"
    out_dtype = x.dtype if out_dtype is None else out_dtype

    in_isz = jnp.dtype(compute_dtype).itemsize
    out_isz = jnp.dtype(out_dtype).itemsize
    KC = K * C_in
    KC_pad = _round_up(KC, 16)   # keep the contraction sublane-aligned (bf16 packs 16)

    vmem_cap = _vmem_capacity_bytes()
    tl = tile_l if tile_l is not None else _pick_tile_l(
        L_out, C_in, C_out, KC_pad, halo, in_isz, out_isz, vmem_cap)
    assert tl % 128 == 0, "L tile must be lane-dense (multiple of 128)"
    L_out_pad = _round_up(L_out, tl)
    num_tiles = L_out_pad // tl

    # Zero-pad so every tile's (TL + halo) window is in bounds, then duplicate
    # the halo into HBM: x_tiles[n, j] = x_pad[n, :, j*TL : j*TL + TL + halo].
    # Extra output columns [L_out, L_out_pad) are garbage and sliced off below.
    pad_right = L_out_pad + halo - (L + padding)
    x_pad = jnp.pad(x.astype(compute_dtype), ((0, 0), (0, 0), (padding, pad_right)))
    x_tiles = jnp.stack(
        [x_pad[:, :, t * tl: t * tl + tl + halo] for t in range(num_tiles)], axis=1)

    # Fused weights: W2[co, k*C_in + ci] = pw[co, ci] * dw[ci, k]  (exact fusion).
    dw2 = dw_w.reshape(C_in, K).astype(jnp.float32)
    pw2 = pw_w.reshape(C_out, C_in).astype(jnp.float32)
    w2 = (pw2[:, None, :] * dw2.T[None, :, :]).reshape(C_out, KC)
    w2 = jnp.pad(w2, ((0, 0), (0, KC_pad - KC))).astype(compute_dtype)
    # Fold the depthwise bias into the pointwise bias (1x1 conv is linear).
    b_eff = (pw2 @ dw_b.reshape(C_in, 1).astype(jnp.float32)
             + pw_b.reshape(C_out, 1).astype(jnp.float32))

    kernel = functools.partial(
        _dwsep_fused_kernel, kernel_size=K, dilation=dilation,
        tile_l=tl, c_in=C_in, kc_pad=KC_pad)

    need = _per_step_vmem_bytes(tl, C_in, C_out, KC_pad, halo, in_isz, out_isz)
    vmem_limit = int(min(vmem_cap * 3 // 4, max(32 * 1024 * 1024, 4 * need)))

    out = pl.pallas_call(
        kernel,
        out_shape=jax.ShapeDtypeStruct((N, C_out, L_out_pad), out_dtype),
        grid_spec=pltpu.PrefetchScalarGridSpec(
            num_scalar_prefetch=0,
            grid=(N, num_tiles),
            in_specs=[
                # halo'd input tiles: blocked over (batch, tile), full (C_in, TL+halo)
                pl.BlockSpec((None, None, C_in, tl + halo), lambda n, j: (n, j, 0, 0)),
                pl.BlockSpec((C_out, KC_pad), lambda n, j: (0, 0)),  # fused weights
                pl.BlockSpec((C_out, 1), lambda n, j: (0, 0)),       # fused bias
            ],
            out_specs=pl.BlockSpec((None, C_out, tl), lambda n, j: (n, 0, j)),
        ),
        # Both axes are independent (no cross-tile accumulation), so both are
        # "parallel": a v7x chip uses both TensorCores even with batch == 1.
        compiler_params=pltpu.CompilerParams(
            dimension_semantics=("parallel", "parallel"),
            vmem_limit_bytes=vmem_limit),
    )(x_tiles, w2, b_eff)
    return out[:, :, :L_out]


def _reference(x, dw_w, dw_b, pw_w, pw_b, *, dilation, padding):
    # Pure-JAX reference via lax.conv_general_dilated (NCL layout).
    C_in = x.shape[1]
    dw = jax.lax.conv_general_dilated(
        x, dw_w, window_strides=(1,), padding=[(padding, padding)],
        rhs_dilation=(dilation,), feature_group_count=C_in,
        dimension_numbers=("NCH", "OIH", "NCH"),
        precision=jax.lax.Precision.HIGHEST)
    dw = dw + dw_b[None, :, None]
    pw = jax.lax.conv_general_dilated(
        dw, pw_w, window_strides=(1,), padding=[(0, 0)],
        dimension_numbers=("NCH", "OIH", "NCH"),
        precision=jax.lax.Precision.HIGHEST)
    return pw + pw_b[None, :, None]


if __name__ == "__main__":
    def init_params(key, C_in, C_out, K):
        # PyTorch Conv1d default init: U(-b, b), b = 1/sqrt(fan_in).
        k1, k2, k3, k4 = jax.random.split(key, 4)
        bound_dw = 1.0 / math.sqrt(K)        # groups=C_in -> fan_in = K
        bound_pw = 1.0 / math.sqrt(C_in)
        dw_w = jax.random.uniform(k1, (C_in, 1, K), jnp.float32, -bound_dw, bound_dw)
        dw_b = jax.random.uniform(k2, (C_in,), jnp.float32, -bound_dw, bound_dw)
        pw_w = jax.random.uniform(k3, (C_out, C_in, 1), jnp.float32, -bound_pw, bound_pw)
        pw_b = jax.random.uniform(k4, (C_out,), jnp.float32, -bound_pw, bound_pw)
        return dw_w, dw_b, pw_w, pw_b

    kx1, kp1, kx2, kp2 = jax.random.split(jax.random.PRNGKey(0), 4)

    # Case 1: tiny shapes matching the module's typical use (single L tile, f32).
    N, C_in, C_out, L = 2, 4, 8, 16
    K, dilation, padding = 3, 2, 2            # L_out = 16 + 4 - 4 = 16
    x = jax.random.normal(kx1, (N, C_in, L), jnp.float32)
    params = init_params(kp1, C_in, C_out, K)
    out = depthwise_separable_conv1d(x, *params, kernel_size=K,
                                     dilation=dilation, padding=padding)
    out = jax.block_until_ready(out)
    ref = _reference(x, *params, dilation=dilation, padding=padding)
    assert out.shape == ref.shape, (out.shape, ref.shape)
    assert jnp.allclose(out, ref, atol=1e-4, rtol=1e-4), "mismatch (small, f32)"

    # Case 2: larger channels + multi-tile L -> fused K*C_in=192 MXU contraction,
    # halo-duplicated tiling and the two-axis-parallel grid.
    N2, C2i, C2o, L2 = 2, 64, 48, 300
    K2, dil2, pad2 = 3, 2, 3                  # L_out = 302 -> 3 tiles of 128
    x2 = jax.random.normal(kx2, (N2, C2i, L2), jnp.float32)
    params2 = init_params(kp2, C2i, C2o, K2)
    ref2 = _reference(x2, *params2, dilation=dil2, padding=pad2)

    out2 = depthwise_separable_conv1d(x2, *params2, kernel_size=K2,
                                      dilation=dil2, padding=pad2, tile_l=128)
    out2 = jax.block_until_ready(out2)
    assert out2.shape == ref2.shape
    assert jnp.allclose(out2, ref2, atol=1e-4, rtol=1e-4), "mismatch (large, f32)"

    # bf16 end-to-end data path (input tiles, fused weights and output in bf16,
    # f32 accumulation on the MXU) — the bandwidth-optimal path on v5e/v6e/v7x.
    out2_bf = depthwise_separable_conv1d(x2, *params2, kernel_size=K2,
                                         dilation=dil2, padding=pad2,
                                         compute_dtype=jnp.bfloat16,
                                         out_dtype=jnp.bfloat16)
    out2_bf = jax.block_until_ready(out2_bf)
    assert jnp.allclose(out2_bf.astype(jnp.float32), ref2,
                        atol=7e-2, rtol=7e-2), "mismatch (bf16 path)"

    print("KERNEL_OK")
</pallas_src>

<mosaic_0001>
module attributes {stable_mosaic.version = 11 : i64} {
  func.func @_dwsep_fused_kernel(%arg0: i32, %arg1: i32, %arg2: memref<1x1x4x132xf32, #tpu.memory_space<vmem>>, %arg3: memref<8x16xf32, #tpu.memory_space<vmem>>, %arg4: memref<8x1xf32, #tpu.memory_space<vmem>>, %arg5: memref<1x8x128xf32, #tpu.memory_space<vmem>>) attributes {dimension_semantics = [#tpu.dimension_semantics<parallel>, #tpu.dimension_semantics<parallel>], iteration_bounds = array<i64: 2, 1>, scalar_prefetch = 0 : i64, scratch_operands = 0 : i64, tpu.core_type = #tpu.core_type<tc>, window_params = [{transform_indices = @transform_0, window_bounds = array<i64: 1, 1, 4, 132>}, {pipeline_mode = #tpu.pipeline_mode<synchronous>, transform_indices = @transform_1, window_bounds = array<i64: 8, 16>}, {pipeline_mode = #tpu.pipeline_mode<synchronous>, transform_indices = @transform_2, window_bounds = array<i64: 8, 1>}, {transform_indices = @transform_3, window_bounds = array<i64: 1, 8, 128>}]} {
    %c0 = arith.constant 0 : index
    %c0_0 = arith.constant 0 : index
    %c0_1 = arith.constant 0 : index
    %c0_2 = arith.constant 0 : index
    %0 = vector.load %arg2[%c0, %c0_0, %c0_1, %c0_2] : memref<1x1x4x132xf32, #tpu.memory_space<vmem>>, vector<1x1x4x128xf32>
    %1 = vector.shape_cast %0 : vector<1x1x4x128xf32> to vector<4x128xf32>
    %c0_3 = arith.constant 0 : index
    %c0_4 = arith.constant 0 : index
    %c0_5 = arith.constant 0 : index
    %c2 = arith.constant 2 : index
    %2 = vector.load %arg2[%c0_3, %c0_4, %c0_5, %c2] : memref<1x1x4x132xf32, #tpu.memory_space<vmem>>, vector<1x1x4x128xf32>
    %3 = vector.shape_cast %2 : vector<1x1x4x128xf32> to vector<4x128xf32>
    %c0_6 = arith.constant 0 : index
    %c0_7 = arith.constant 0 : index
    %c0_8 = arith.constant 0 : index
    %c4 = arith.constant 4 : index
    %4 = vector.load %arg2[%c0_6, %c0_7, %c0_8, %c4] : memref<1x1x4x132xf32, #tpu.memory_space<vmem>>, vector<1x1x4x128xf32>
    %5 = vector.shape_cast %4 : vector<1x1x4x128xf32> to vector<4x128xf32>
    %cst = arith.constant 0.000000e+00 : f32
    %6 = vector.broadcast %cst : f32 to vector<4x128xf32>
    %7 = tpu.concatenate %1, %3, %5, %6 in 0 : vector<4x128xf32>, vector<4x128xf32>, vector<4x128xf32>, vector<4x128xf32> -> vector<16x128xf32>
    %c0_9 = arith.constant 0 : index
    %c0_10 = arith.constant 0 : index
    %8 = vector.load %arg3[%c0_9, %c0_10] : memref<8x16xf32, #tpu.memory_space<vmem>>, vector<8x16xf32>
    %cst_11 = arith.constant dense<0.000000e+00> : vector<8x128xf32>
    %9 = tpu.matmul %8, %7, %cst_11 {dimension_numbers = #tpu.dot_dimension_numbers<[1], [0], [0], [1], [0, 0, 1, 1], [], []>} : vector<8x16xf32>, vector<16x128xf32>, vector<8x128xf32> -> vector<8x128xf32>
    %c0_12 = arith.constant 0 : index
    %c0_13 = arith.constant 0 : index
    %10 = vector.load %arg4[%c0_12, %c0_13] : memref<8x1xf32, #tpu.memory_space<vmem>>, vector<8x1xf32>
    %11 = vector.broadcast %10 : vector<8x1xf32> to vector<8x128xf32>
    %12 = arith.addf %9, %11 : vector<8x128xf32>
    %c0_14 = arith.constant 0 : index
    %c0_15 = arith.constant 0 : index
    %c0_16 = arith.constant 0 : index
    %13 = vector.load %arg5[%c0_14, %c0_15, %c0_16] : memref<1x8x128xf32, #tpu.memory_space<vmem>>, vector<1x8x128xf32>
    %14 = vector.shape_cast %13 : vector<1x8x128xf32> to vector<8x128xf32>
    %15 = vector.shape_cast %12 : vector<8x128xf32> to vector<1x8x128xf32>
    tpu.vector_store %arg5[%c0_14, %c0_15, %c0_16], %15 {strides = array<i32>} : memref<1x8x128xf32, #tpu.memory_space<vmem>>, vector<1x8x128xf32>,
    return
  }
  func.func @transform_0(%arg0: i32, %arg1: i32) -> (i32, i32, i32, i32) {
    %c0_i32 = arith.constant 0 : i32
    %c0_i32_0 = arith.constant 0 : i32
    %c0_i32_1 = arith.constant 0 : i32
    return %arg0, %arg1, %c0_i32, %c0_i32_0 : i32, i32, i32, i32
  }
  func.func @transform_1(%arg0: i32, %arg1: i32) -> (i32, i32) {
    %c0_i32 = arith.constant 0 : i32
    %c0_i32_0 = arith.constant 0 : i32
    %c0_i32_1 = arith.constant 0 : i32
    return %c0_i32, %c0_i32_0 : i32, i32
  }
  func.func @transform_2(%arg0: i32, %arg1: i32) -> (i32, i32) {
    %c0_i32 = arith.constant 0 : i32
    %c0_i32_0 = arith.constant 0 : i32
    %c0_i32_1 = arith.constant 0 : i32
    return %c0_i32, %c0_i32_0 : i32, i32
  }
  func.func @transform_3(%arg0: i32, %arg1: i32) -> (i32, i32, i32) {
    %c0_i32 = arith.constant 0 : i32
    %c0_i32_0 = arith.constant 0 : i32
    return %arg0, %c0_i32, %arg1 : i32, i32, i32
  }
}

</mosaic_0001>

<bundles_post_ra>
// kernel: tpu_custom_call.1
= control target key start
LH: loop header
LB: loop body
LE: loop exit
PB: predicated region body
PF: predicated region fallthrough
CT: control target
= control target key end

     0   :  { %8 = vsyncpa [#allocation3], 0  ;;  %s845_s0 = inlined_call_operand.hbm [shape: f32[2,1,4,132], index: 0, kind: input, shape index: {}]   ;;  %s846_s1 = inlined_call_operand.vmem [shape: f32[8,16], index: 1, kind: input, shape index: {}]   ;;  %s847_s2 = inlined_call_operand.vmem [shape: f32[8,1], index: 2, kind: input, shape index: {}]   ;;  %s848_s3 = inlined_call_operand.hbm [shape: f32[2,8,128], index: 3, kind: output, shape index: {}]  }
   0x1   :  { %10 = vsyncpa [#allocation3 + $0x1], 0 }
   0x2   :  { %11 = vsyncpa [#allocation4], 0 }
   0x3   :  { %13 = vsyncpa [#allocation4 + $0x1], 0  ;;  %s663_s12 = smov 0   ;;  %s665_s13 = smov 0  }
   0x4   :  { %s667_s14 = smov 0   ;;  %s669_s15 = smov 0  }
   0x5   :  { %s671_s16 = smov 0   ;;  %s673_s17 = smov 0  }
   0x6 LB: > { %s406_s18 = sadd.s32 4294967295, %s632_s17   ;;  %s407_s19 = sadd.s32 4294967294, %s632_s17   ;;  %s632_s17 = sphi %s673_s17, %s19_s17   ;;  %s628_s16 = sphi %s671_s16, %s864_s16   ;;  %s624_s15 = sphi %s669_s15, %s863_s15   ;;  %s620_s14 = sphi %s667_s14, %s862_s14   ;;  %s616_s13 = sphi %s665_s13, %s861_s13   ;;  %s612_s12 = sphi %s663_s12, %s860_s12  }
   0x7   : > { %s31_s20 = sadd.s32 1, %s628_s16  ;;  %s40_s21 = sadd.s32 1, %s620_s14 }
   0x8   : > { %p33_p0 = scmp.ge.s32.totalorder %s31_s20, 2  ;;  %p47_p1 = scmp.ne.s32.totalorder %s620_s14, %s616_s13 }
   0x9   : > { %p48_p2 = scmp.eq.s32.totalorder %s632_s17, 0  ;;  %p53_p3 = scmp.ne.s32.totalorder %s616_s13, %s612_s12 }
   0xa   : > { %s866_s20 = smov (%p33_p0, %s31_s20), 0  ;;  %p54_p5 = scmp.eq.s32.totalorder %s406_s18, 0 }
   0xb   : > { %p704_p4 = por %p48_p2, %p47_p1  ;;  %s35_s23 = ssub.s32 %s628_s16, %s866_s20 }
   0xc   : > { %p121_p6 = scmp.eq.s32.totalorder %s406_s18, 1  ;;  %p38_p7 = scmp.eq.s32.totalorder %s35_s23, 0 }
   0xd   : > { %p710_p8 = por %p54_p5, %p53_p3  ;;  %p127_p10 = scmp.eq.s32.totalorder %s407_s19, 1 }
   0xe   : > { %p714_p9 = por %p121_p6, %p47_p1  ;;  %p449_p13 = scmp.lt.s32.totalorder %s632_s17, 2 }
   0xf   : > { %s719_s26 = scalar_select %p38_p7, %s620_s14, %s40_s21  }
  0x10   : > { %s852_s25 = scalar_select %p714_p9, 1, 0 }
  0x11   : > { %p721_p11 = por %p127_p10, %p53_p3  ;;  %s153_s28 = sand.u32 1, %s620_s14  }
  0x12   : > { %s410_s29 = sshll.u32 %s153_s28, 3  ;;  %s422_s30 = sshll.u32 %s628_s16, 7 }
  0x13   : > { %s853_s27 = scalar_select %p721_p11, 1, 0 }
  0x14   : > { %s732_s6 = scalar_lea.hbm %s845_s0, %s422_s30  ;;  %s157_s7 = scalar_lea.vmem [#allocation2], %s410_s29 }
  0x15   : > { %s167_s8 = sshll.u32 %s157_s7, 4  ;;  %p738_p0 = pnand %p449_p13, %p704_p4  ;;  %s734_s8 = int_to_ptr.vmem [resolvable:$true] %s167_s8 }
  0x16   : > { %s154_s10 = scalar_lea.sflag [#allocation3], %s153_s28  ;;  %s520_s11 = scalar_lea.hbm %s732_s6, 128 }
  0x17   : > { %p521_p3 = scmp.ne.s32.totalorder %s732_s6, %s520_s11  ;;  %p522_p5 = pneg %p738_p0 }
  0x18   : > { %s525_s21 = scalar_lea.hbm %s845_s0, 256  ;;  %p526_p4 = scmp.lt.u32.totalorder %s732_s6, %s845_s0 }
  0x19   : > { %p523_p6 = pnand %p522_p5, %p521_p3  ;;  %p527_p10 = scmp.lt.u32.totalorder %s525_s21, %s520_s11 }
  0x1a   : > { %p529_p12 = scmp.lt.u32.totalorder %s520_s11, %s732_s6 }
  0x1b   : > { %p524_p7 = pneg %p523_p6  ;;  %p528_p13 = por %p527_p10, %p526_p4 }
  0x1d   : > { %p530_p1 = por %p529_p12, %p528_p13 }
  0x1f   : > { %p531_p2 = pnand %p530_p1, %p524_p7 }
  0x21   : > { %534 = shalt.err (!%p531_p2)
}
  0x22   : > { %s535_s28 = scalar_lea.vmem %s734_s8, 128  ;;  %s634_s29 = smov [#allocation2]  }
  0x23   : > { %p536_p3 = scmp.ne.s32.totalorder %s734_s8, %s535_s28  ;;  %s540_s30 = sshll.u32 %s634_s29, 4  ;;  %s541_s30 = int_to_ptr.vmem [resolvable:$false] %s540_s30 }
  0x24   : > { %s542_s4 = scalar_lea.vmem %s541_s30, 256  ;;  %p543_p9 = scmp.lt.s32.totalorder %s734_s8, %s541_s30 }
  0x25   : > { %p538_p6 = pnand %p536_p3, %p522_p5  ;;  %p544_p4 = scmp.lt.s32.totalorder %s542_s4, %s535_s28 }
  0x27   : > { %p539_p11 = pneg %p538_p6  ;;  %p545_p10 = por %p544_p4, %p543_p9 }
  0x29   : > { %p546_p12 = pnand %p545_p10, %p539_p11 }
  0x2b   : > { %549 = shalt.err (!%p546_p12)
}
  0x2c   : > { %444 = dma.hbm_to_vmem [thread:$0]  (!%p738_p0), %s732_s6, 128, %s734_s8, %s154_s10  }
  0x2d   : > { %p855_p1 = scmp.lt.s32.totalorder %s632_s17, 3  ;;  %p856_p2 = scmp.ge.s32.totalorder %s632_s17, 1 }
  0x2f   : > { %p173_p5 = pnand %p856_p2, %p855_p1 }
  0x30   : > { %s774_s5 = sand.u32 (!%p173_p5), 1, %s616_s13  }
  0x31   : > { %176 = sbr.rel (%p173_p5) target bundleno = 417 (0x1a1), region = 32  ;;  %s414_s7 = sshll.u32 (!%p173_p5), %s774_s5, 3 }
  0x32   : > { %s179_s11 = scalar_lea.sflag (!%p173_p5), [#allocation3], %s774_s5  ;;  %s182_s9 = scalar_lea.vmem (!%p173_p5), [#allocation2], %s414_s7 }
  0x38   : > { %603 = dma.done.wait (%p710_p8), %s179_s11, 128  }
  0x39   : > { %605 = vsyncadd (%p710_p8), %s179_s11, 4294967168  ;;  %v635_v0 = vmov 0.0|0.0   ;;  %v206_v1 = vld [vmem:[%s182_s9] sm:$0xff]  ;;  %vm636_vm0 = vmmov 0   ;;  %v637_v4 = vmov 0.0   ;;  %s638_s10 = smov 126  }
  0x3a   : > { %433 = vmatprep.subr.bf16.mxu0 %v635_v0  ;;  %v208_v2 = vcombine.low %v206_v1, %v206_v1  ;;  %v216_v3 = vcombine.high %v206_v1, %v206_v1  ;;  %430 = vmatprep.mubr.msk.f32.mxu0 %vm636_vm0, %v637_v4  ;;  %v228_v6 = vld [vmem:[%s847_s2] sm:$0xff]  ;;  %v639_v8 = vmov 0   ;;  %s640_s24 = smov 124   ;;  %vm213_vm1 = vcmask 1031168   ;;  %s419_s21 = sshll.u32 %s624_s15, 7 }
  0x3b   : > { %516 = vset.pattern.permute.xlu1 %v639_v8  ;;  %517 = vset.pattern.permute.xlu0 %v639_v8  ;;  %v205_v14 = vld [vmem:[%s182_s9] sm:$0xf]  ;;  %vm221_vm2 = vcmask 1014784   ;;  %vm224_vm3 = vcmask 1043456   ;;  %vm641_vm4 = vmmov 1   ;;  %vm234_vm6 = vcmask 130048   ;;  %s796_s30 = scalar_lea.hbm %s848_s3, %s419_s21 }
  0x3c   : > { %v506_v5 = vpack.i.bf16 %v206_v1, %v208_v2  ;;  %v511_v7 = vpack.i.bf16 %v216_v3, %v206_v1  ;;  %231 = vperm.xlu1 %516, %v228_v6   ;;  %vm435_vm5 = vmpackc.low %vm224_vm3, %vm641_vm4  ;;  %v227_v20 = vld [vmem:[%s846_s1] sm:$0xff]  ;;  %s204_s22 = scalar_lea.vmem [#allocation5], %s414_s7  ;;  %s310_s4 = scalar_lea.sflag [#allocation4], %s774_s5 }
  0x3d   : > { %s324_s23 = sshll.u32 %s204_s22, 4  ;;  %p857_p9 = scmp.ne.s32.totalorder %s852_s25, 0  ;;  %s798_s23 = int_to_ptr.vmem [resolvable:$true] %s324_s23 }
  0x3e   : > { %507 = vrot.lane.b32.xlu0 %v506_v5, %s638_s10  ;;  %s550_s11 = scalar_lea.vmem %s798_s23, 128  ;;  %s642_s15 = smov [#allocation5]  }
  0x3f   : > { %p551_p8 = scmp.ne.s32.totalorder %s798_s23, %s550_s11  ;;  %s554_s7 = sshll.u32 %s642_s15, 4  ;;  %s555_s7 = int_to_ptr.vmem [resolvable:$false] %s554_s7 }
  0x40   : > { %s556_s9 = scalar_lea.vmem %s555_s7, 256  ;;  %p557_p7 = scmp.lt.s32.totalorder %s798_s23, %s555_s7 }
  0x41   : > { %p552_p11 = pnand %p551_p8, %p857_p9  ;;  %p558_p13 = scmp.lt.s32.totalorder %s556_s9, %s550_s11 }
  0x42   : > { %512 = vrot.lane.b32.xlu0 %v511_v7, %s640_s24 }
  0x43   : > { %p553_p0 = pneg %p552_p11  ;;  %p559_p3 = por %p558_p13, %p557_p7 }
  0x45   : > { %p560_p6 = pnand %p559_p3, %p553_p0 }
  0xb0   : > { %v508_v9 = vpop.permute.xlu0 %507 }
  0xb1   : > { %v510_v10 = vunpack.i.h.bf16 %v508_v9  ;;  %v509_v11 = vunpack.i.l.bf16 %v508_v9 }
  0xb3   : > { %v214_v12 = vsel %vm213_vm1, %v509_v11, %v510_v10 }
  0xb4   : > { %v513_v13 = vpop.permute.xlu0 %512  ;;  %v225_v18 = vsel %vm224_vm3, %v205_v14, %v214_v12 }
  0xb5   : > { %v515_v15 = vunpack.i.h.bf16 %v513_v13  ;;  %v514_v16 = vunpack.i.l.bf16 %v513_v13 }
  0xb7   : > { %v222_v17 = vsel %vm221_vm2, %v514_v16, %v515_v15 }
  0xb8   : > { %v434_v19 = vpack.c.bf16 %v222_v17, %v225_v18 }
  0xba   : > { %436 = vmatpush3.bf16.msk.msra.mxu0 %vm435_vm5, %v434_v19 }
  0xbb   : > { %v232_v21 = vpop.permute.xlu1 %231 }
  0xbd   : > { %431 = vmatmul.mubr.msk.f32.vlgmr.msra.gmra.mrb[0].mxu0 %vm234_vm6, %v227_v20 }
 0x190   : > { %v304_v22 = vpop.f32.mrb[0].mxu0 }
 0x191   : > { %v305_v23 = vadd.f32 %v304_v22, %v232_v21  ;;  %v432_v24 = vpop.f32.mrb[1].mxu0 }
 0x193   : > { %308 = vst [vmem:[%s204_s22] sm:$0xff] %v305_v23 }
 0x194   : > { %563 = shalt.err (!%p560_p6)
}
 0x195   : > { %s564_s5 = scalar_lea.hbm %s796_s30, 128  ;;  %s568_s10 = scalar_lea.hbm %s848_s3, 256 }
 0x196   : > { %p565_p4 = scmp.ne.s32.totalorder %s796_s30, %s564_s5  ;;  %p569_p1 = scmp.lt.u32.totalorder %s796_s30, %s848_s3 }
 0x197   : > { %p570_p2 = scmp.lt.u32.totalorder %s568_s10, %s564_s5  ;;  %p572_p8 = scmp.lt.u32.totalorder %s564_s5, %s796_s30 }
 0x198   : > { %p566_p10 = pnand %p565_p4, %p857_p9 }
 0x199   : > { %p571_p5 = por %p570_p2, %p569_p1 }
 0x19a   : > { %p567_p12 = pneg %p566_p10 }
 0x19b   : > { %p573_p11 = por %p572_p8, %p571_p5 }
 0x19d   : > { %p574_p0 = pnand %p573_p11, %p567_p12 }
 0x19f   : > { %577 = shalt.err (!%p574_p0)
}
 0x1a0   : > { %439 = dma.vmem_to_hbm [thread:$0]  (%p857_p9), %s798_s23, 128, %s796_s30, %s310_s4  }
 0x1a1 PF: > { %s336_s19 = sand.u32 1, %s612_s12   ;;  %p858_p7 = scmp.ne.s32.totalorder %s853_s27, 0 }
 0x1a2   : > { %p859_p13 = scmp.ge.s32.totalorder %s632_s17, 2  ;;  %s337_s21 = scalar_lea.sflag [#allocation4], %s336_s19 }
 0x1a4   : > { %p446_p3 = pnand %p859_p13, %p858_p7 }
 0x1a6   : > { %607 = dma.done.wait (!%p446_p3), %s337_s21, 128  }
 0x1a7   : > { %609 = vsyncadd (!%p446_p3), %s337_s21, 4294967168  ;;  %s19_s17 = sadd.s32 1, %s632_s17   ;;  %s860_s12 = smov %s616_s13 }
 0x1a8   : > { %p16_p6 = scmp.ge.s32.totalorder %s19_s17, 4   ;;  %s861_s13 = smov %s620_s14 }
 0x1a9   : > { %s862_s14 = smov %s719_s26  ;;  %s863_s15 = smov %s628_s16 }
 0x1aa   : > { %s864_s16 = smov %s866_s20  ;;  %18 = sbr.rel (!%p16_p6) target bundleno = 6 (0x6), region = 77 }
 0x1b1   :  { %342 = vsyncpa [#allocation3], 1 }
 0x1b2   :  { %344 = vsyncpa [#allocation3 + $0x1], 1 }
 0x1b3   :  { %345 = vsyncpa [#allocation4], 1 }
 0x1b4   :  { %347 = vsyncpa [#allocation4 + $0x1], 1 }

</bundles_post_ra>
